<compile_context>
chip_gen: v7x
topology: tpu7x:2x2x1
jax: 0.10.0
libtpu: 0.0.40
codegen_flags: <defaults>
</compile_context>

<pallas_src>
import functools
import math

import jax
import jax.numpy as jnp
from jax.experimental import pallas as pl
from jax.experimental.pallas import tpu as pltpu

_TARGET_BLOCK_BYTES = 2 * 1024 * 1024   # ~2 MiB per block per buffer
_SMALL_BYTES = 2 * 1024 * 1024          # single-block fast-path threshold


def _sublane_multiple(dtype) -> int:
    """Minimum sublane multiple for a dtype (packing-aware)."""
    itemsize = jnp.dtype(dtype).itemsize
    if itemsize >= 4:
        return 8
    if itemsize == 2:
        return 16
    return 32


def _lambda_kernel(x_ref, o_ref, *, f):
    # The whole point of LambdaLayer: apply the stored callable to the tile.
    o_ref[...] = f(x_ref[...]).astype(o_ref.dtype)


class LambdaLayer:
    """Pallas equivalent of the PyTorch LambdaLayer: forward(x) = f(x).

    `f` must be an elementwise (shape-preserving) JAX-traceable callable so it
    can be applied tile-by-tile inside the kernel.
    """
    # TODO(synk): arbitrary (non-elementwise / shape-changing) lambdas cannot be
    # expressed by a single generic tiled kernel; only shape-preserving f supported.

    def __init__(self, f):
        self.f = f

    def __call__(self, x):
        orig_shape = x.shape
        n = math.prod(orig_shape) if orig_shape else 1

        # Output dtype of `f` via abstract eval only (no compute); also checks
        # that `f` is shape-preserving (documented restriction).
        out_aval = jax.eval_shape(self.f, jax.ShapeDtypeStruct(x.shape, x.dtype))
        out_dtype = out_aval.dtype
        assert out_aval.shape == orig_shape, (
            "LambdaLayer Pallas kernel only supports shape-preserving f")

        kernel = functools.partial(_lambda_kernel, f=self.f)
        in_bytes = n * jnp.dtype(x.dtype).itemsize
        out_bytes = n * jnp.dtype(out_dtype).itemsize

        # ---------- small fast path: whole array in one VMEM block ----------
        if max(in_bytes, out_bytes) <= _SMALL_BYTES:
            return pl.pallas_call(
                kernel,
                out_shape=jax.ShapeDtypeStruct(orig_shape, out_dtype),
            )(x)

        # ---------- large path: lane-dense 2D slab, big aligned tiles ----------
        flat = x.reshape(-1)

        # Widest lane dimension (multiple of 128) that exactly divides n, so we
        # avoid a full-array jnp.pad copy; pad only as a last resort.
        lane_w = None
        for cand in (8192, 4096, 2048, 1024, 512, 384, 256, 128):
            if n % cand == 0:
                lane_w = cand
                break
        pad = 0
        if lane_w is None:
            lane_w = 1024
            pad = (-n) % lane_w
            flat = jnp.pad(flat, (0, pad))   # rare fallback for ragged sizes

        rows = flat.shape[0] // lane_w
        x2 = flat.reshape(rows, lane_w)

        # Dtype-aware sublane packing; honor both input and output dtypes.
        mult = max(_sublane_multiple(x.dtype), _sublane_multiple(out_dtype))
        max_itemsize = max(jnp.dtype(x.dtype).itemsize,
                           jnp.dtype(out_dtype).itemsize)
        block_rows = _TARGET_BLOCK_BYTES // (lane_w * max_itemsize)
        block_rows = max(mult, (block_rows // mult) * mult)
        block_rows = min(block_rows, max(mult, (rows // mult) * mult))

        grid = (pl.cdiv(rows, block_rows),)

        out2 = pl.pallas_call(
            kernel,
            out_shape=jax.ShapeDtypeStruct((rows, lane_w), out_dtype),
            grid=grid,
            in_specs=[pl.BlockSpec((block_rows, lane_w), lambda i: (i, 0))],
            out_specs=pl.BlockSpec((block_rows, lane_w), lambda i: (i, 0)),
            compiler_params=pltpu.CompilerParams(
                dimension_semantics=("parallel",)),
        )(x2)

        if pad:
            return out2.reshape(-1)[:n].reshape(orig_shape)
        return out2.reshape(orig_shape)


if __name__ == "__main__":
    key = jax.random.PRNGKey(0)

    # Deterministic example lambda (elementwise), analogous to a
    # `LambdaLayer(lambda x: ...)` usage in the original AOT inpainting code.
    f = lambda t: jnp.maximum(t, 0.0) + 0.2 * jnp.minimum(t, 0.0)  # leaky-relu-ish
    layer = LambdaLayer(f)

    # 1) Small NCHW input (exercises the single-block fast path).
    x_small = jax.random.normal(key, (2, 4, 16, 16), dtype=jnp.float32)
    y_small = jax.block_until_ready(layer(x_small))
    y_small_ref = f(x_small)
    assert y_small.shape == x_small.shape and y_small.dtype == x_small.dtype
    assert jnp.allclose(y_small, y_small_ref, atol=1e-6, rtol=1e-6)

    # 2) Medium feature map (exercises the tiled, lane-dense large path).
    x_big = jax.random.normal(key, (4, 8, 256, 256), dtype=jnp.float32)
    y_big = jax.block_until_ready(layer(x_big))
    y_big_ref = f(x_big)
    assert y_big.shape == x_big.shape and y_big.dtype == x_big.dtype
    assert jnp.allclose(y_big, y_big_ref, atol=1e-6, rtol=1e-6)

    print("KERNEL_OK")
</pallas_src>

<mosaic_0001>
module attributes {stable_mosaic.version = 11 : i64} {
  func.func @_lambda_kernel(%arg0: memref<2x4x16x16xf32, #tpu.memory_space<vmem>>, %arg1: memref<2x4x16x16xf32, #tpu.memory_space<vmem>>) attributes {dimension_semantics = [], scalar_prefetch = 0 : i64, scratch_operands = 0 : i64, tpu.core_type = #tpu.core_type<tc>} {
    %c0 = arith.constant 0 : index
    %c0_0 = arith.constant 0 : index
    %c0_1 = arith.constant 0 : index
    %c0_2 = arith.constant 0 : index
    %0 = vector.load %arg0[%c0, %c0_0, %c0_1, %c0_2] : memref<2x4x16x16xf32, #tpu.memory_space<vmem>>, vector<2x4x16x16xf32>
    %cst = arith.constant 0.000000e+00 : f32
    %1 = vector.broadcast %cst : f32 to vector<2x4x16x16xf32>
    %2 = arith.maximumf %0, %1 : vector<2x4x16x16xf32>
    %cst_3 = arith.constant 0.000000e+00 : f32
    %3 = vector.broadcast %cst_3 : f32 to vector<2x4x16x16xf32>
    %4 = arith.minimumf %0, %3 : vector<2x4x16x16xf32>
    %cst_4 = arith.constant 2.000000e-01 : f32
    %5 = vector.broadcast %cst_4 : f32 to vector<2x4x16x16xf32>
    %6 = arith.mulf %5, %4 : vector<2x4x16x16xf32>
    %7 = arith.addf %2, %6 : vector<2x4x16x16xf32>
    %c0_5 = arith.constant 0 : index
    %c0_6 = arith.constant 0 : index
    %c0_7 = arith.constant 0 : index
    %c0_8 = arith.constant 0 : index
    %8 = vector.load %arg1[%c0_5, %c0_6, %c0_7, %c0_8] : memref<2x4x16x16xf32, #tpu.memory_space<vmem>>, vector<2x4x16x16xf32>
    tpu.vector_store %arg1[%c0_5, %c0_6, %c0_7, %c0_8], %7 {strides = array<i32>} : memref<2x4x16x16xf32, #tpu.memory_space<vmem>>, vector<2x4x16x16xf32>,
    return
  }
}

</mosaic_0001>

<bundles_post_ra>
// kernel: tpu_custom_call.1
= control target key start
LH: loop header
LB: loop body
LE: loop exit
PB: predicated region body
PF: predicated region fallthrough
CT: control target
= control target key end

     0   :  { %6 = vsyncpa [#allocation3], 0  ;;  %s249_s0 = inlined_call_operand.hbm [shape: f32[2,4,16,16], index: 0, kind: input, shape index: {}]   ;;  %s250_s1 = inlined_call_operand.hbm [shape: f32[2,4,16,16], index: 1, kind: output, shape index: {}]  }
   0x1   :  { %7 = vsyncpa [#allocation4], 0  ;;  %s189_s6 = smov [#allocation2]   ;;  %s141_s10 = scalar_lea.hbm %s249_s0, 2048 }
   0x2   :  { %s13_s7 = sshll.u32 %s189_s6, 4  ;;  %p142_p0 = scmp.ne.s32.totalorder %s249_s0, %s141_s10  ;;  %s14_s7 = int_to_ptr.vmem [resolvable:$true] %s13_s7 }
   0x3   :  { %p145_p1 = scmp.lt.u32.totalorder %s141_s10, %s249_s0 }
   0x5   :  { %p147_p2 = pnand %p145_p1, %p142_p0 }
   0x7   :  { %150 = shalt.err (!%p147_p2)
}
   0x8   :  { %s151_s15 = scalar_lea.vmem %s14_s7, 2048  ;;  %p156_p4 = scmp.lt.s32.totalorder %s14_s7, %s14_s7 }
   0x9   :  { %p152_p3 = scmp.ne.s32.totalorder %s14_s7, %s151_s15  ;;  %p157_p5 = scmp.lt.s32.totalorder %s151_s15, %s151_s15 }
   0xb   :  { %p158_p6 = por %p157_p5, %p156_p4 }
   0xd   :  { %p159_p7 = pnand %p158_p6, %p152_p3 }
   0xf   :  { %162 = shalt.err (!%p159_p7)
}
  0x10   :  { %s190_s16 = smov 128   ;;  %s191_s17 = smov 8  }
  0x11   :  { %19 = dma.hbm_to_vmem [thread:$0]  %s249_s0, 2048, %s14_s7, [#allocation3], %s190_s16, %s190_s16, %s191_s17  }
  0x12   :  { %185 = dma.done.wait [#allocation3], 2048  }
  0x13   :  { %186 = vsyncadd [#allocation3], 4294965248  ;;  %v23_v0 = vld [vmem:[#allocation2] sm:$0xff]  ;;  %vm103_vm0 = vcmask 130048   ;;  %v24_v1 = vld [vmem:[#allocation2 + $0x8] sm:$0xff]  ;;  %s192_s0 = smov [#allocation5]  }
  0x14   :  { %v25_v2 = vld [vmem:[#allocation2 + $0x10] sm:$0xff]  ;;  %v39_v3 = vmax.f32 %v23_v0, 0.0  ;;  %v55_v4 = vmin.f32 %v23_v0, 0.0  ;;  %v40_v5 = vmax.f32 %v24_v1, 0.0  ;;  %v56_v6 = vmin.f32 %v24_v1, 0.0  ;;  %v26_v7 = vld [vmem:[#allocation2 + $0x18] sm:$0xff] }
  0x15   :  { %v27_v8 = vld [vmem:[#allocation2 + $0x20] sm:$0xff]  ;;  %v41_v9 = vmax.f32 %v25_v2, 0.0  ;;  %v57_v10 = vmin.f32 %v25_v2, 0.0  ;;  %v42_v11 = vmax.f32 %v26_v7, 0.0  ;;  %v58_v12 = vmin.f32 %v26_v7, 0.0  ;;  %v28_v13 = vld [vmem:[#allocation2 + $0x28] sm:$0xff] }
  0x16   :  { %v29_v14 = vld [vmem:[#allocation2 + $0x30] sm:$0xff]  ;;  %v71_v15 = vmul.f32 0.2, %v55_v4  ;;  %v72_v16 = vmul.f32 0.2, %v56_v6  ;;  %v43_v17 = vmax.f32 %v27_v8, 0.0 }
  0x17   :  { %v59_v18 = vmin.f32 %v27_v8, 0.0  ;;  %v73_v19 = vmul.f32 0.2, %v57_v10  ;;  %v74_v20 = vmul.f32 0.2, %v58_v12  ;;  %v44_v21 = vmax.f32 %v28_v13, 0.0 }
  0x18   :  { %v60_v22 = vmin.f32 %v28_v13, 0.0  ;;  %v87_v23 = vadd.f32 %v71_v15, %v39_v3  ;;  %v88_v24 = vadd.f32 %v72_v16, %v40_v5  ;;  %v45_v26 = vmax.f32 %v29_v14, 0.0  ;;  %v30_v27 = vld [vmem:[#allocation2 + $0x38] sm:$0xff]  ;;  %v31_v28 = vld [vmem:[#allocation2 + $0x40] sm:$0xff]  ;;  %v32_v33 = vld [vmem:[#allocation2 + $0x48] sm:$0xff]  ;;  %s125_s20 = sshll.u32 %s192_s0, 4  ;;  %s126_s20 = int_to_ptr.vmem [resolvable:$true] %s125_s20 }
  0x19   :  { %v75_v25 = vmul.f32 0.2, %v59_v18  ;;  %v89_v29 = vadd.f32 %v73_v19, %v41_v9  ;;  %v90_v30 = vadd.f32 %v74_v20, %v42_v11  ;;  %v61_v32 = vmin.f32 %v29_v14, 0.0  ;;  %v33_v34 = vld [vmem:[#allocation2 + $0x50] sm:$0xff]  ;;  %v34_v39 = vld [vmem:[#allocation2 + $0x58] sm:$0xff]  ;;  %v35_v48 = vld [vmem:[#allocation2 + $0x60] sm:$0xff]  ;;  %p168_p9 = scmp.lt.s32.totalorder %s126_s20, %s126_s20 }
  0x1a   :  { %v76_v31 = vmul.f32 0.2, %v60_v22  ;;  %104 = vst.msk [vmem:[#allocation5] sm:$0xff] %vm103_vm0, %v87_v23  ;;  %105 = vst.msk [vmem:[#allocation5 + $0x8] sm:$0xff] %vm103_vm0, %v88_v24  ;;  %v46_v36 = vmax.f32 %v30_v27, 0.0  ;;  %v62_v37 = vmin.f32 %v30_v27, 0.0 }
  0x1b   :  { %v91_v35 = vadd.f32 %v75_v25, %v43_v17  ;;  %v47_v38 = vmax.f32 %v31_v28, 0.0  ;;  %106 = vst.msk [vmem:[#allocation5 + $0x10] sm:$0xff] %vm103_vm0, %v89_v29  ;;  %107 = vst.msk [vmem:[#allocation5 + $0x18] sm:$0xff] %vm103_vm0, %v90_v30  ;;  %v77_v41 = vmul.f32 0.2, %v61_v32  ;;  %v63_v42 = vmin.f32 %v31_v28, 0.0 }
  0x1c   :  { %v92_v40 = vadd.f32 %v76_v31, %v44_v21  ;;  %v48_v43 = vmax.f32 %v32_v33, 0.0  ;;  %v78_v44 = vmul.f32 0.2, %v62_v37  ;;  %v64_v45 = vmin.f32 %v32_v33, 0.0  ;;  %v36_v53 = vld [vmem:[#allocation2 + $0x68] sm:$0xff]  ;;  %v37_v57 = vld [vmem:[#allocation2 + $0x70] sm:$0xff] }
  0x1d   :  { %108 = vst.msk [vmem:[#allocation5 + $0x20] sm:$0xff] %vm103_vm0, %v91_v35  ;;  %v49_v46 = vmax.f32 %v33_v34, 0.0  ;;  %v65_v47 = vmin.f32 %v33_v34, 0.0  ;;  %v93_v49 = vadd.f32 %v77_v41, %v45_v26  ;;  %v79_v50 = vmul.f32 0.2, %v63_v42  ;;  %v38_v62 = vld [vmem:[#allocation2 + $0x78] sm:$0xff] }
  0x1e   :  { %109 = vst.msk [vmem:[#allocation5 + $0x28] sm:$0xff] %vm103_vm0, %v92_v40  ;;  %v50_v51 = vmax.f32 %v34_v39, 0.0  ;;  %v66_v52 = vmin.f32 %v34_v39, 0.0  ;;  %v94_v54 = vadd.f32 %v78_v44, %v46_v36  ;;  %v80_v55 = vmul.f32 0.2, %v64_v45  ;;  %s163_s21 = scalar_lea.vmem %s126_s20, 2048 }
  0x1f   :  { %v81_v56 = vmul.f32 0.2, %v65_v47  ;;  %110 = vst.msk [vmem:[#allocation5 + $0x30] sm:$0xff] %vm103_vm0, %v93_v49  ;;  %v95_v58 = vadd.f32 %v79_v50, %v47_v38  ;;  %v51_v60 = vmax.f32 %v35_v48, 0.0  ;;  %v67_v61 = vmin.f32 %v35_v48, 0.0  ;;  %p164_p8 = scmp.ne.s32.totalorder %s126_s20, %s163_s21  ;;  %p169_p10 = scmp.lt.s32.totalorder %s163_s21, %s163_s21 }
  0x20   :  { %v82_v59 = vmul.f32 0.2, %v66_v52  ;;  %111 = vst.msk [vmem:[#allocation5 + $0x38] sm:$0xff] %vm103_vm0, %v94_v54  ;;  %v96_v63 = vadd.f32 %v80_v55, %v48_v43  ;;  %v52_v1 = vmax.f32 %v36_v53, 0.0  ;;  %v68_v2 = vmin.f32 %v36_v53, 0.0 }
  0x21   :  { %v97_v0 = vadd.f32 %v81_v56, %v49_v46  ;;  %112 = vst.msk [vmem:[#allocation5 + $0x40] sm:$0xff] %vm103_vm0, %v95_v58  ;;  %v83_v4 = vmul.f32 0.2, %v67_v61  ;;  %v53_v5 = vmax.f32 %v37_v57, 0.0  ;;  %v69_v6 = vmin.f32 %v37_v57, 0.0  ;;  %p170_p11 = por %p169_p10, %p168_p9 }
  0x22   :  { %v98_v3 = vadd.f32 %v82_v59, %v50_v51  ;;  %113 = vst.msk [vmem:[#allocation5 + $0x48] sm:$0xff] %vm103_vm0, %v96_v63  ;;  %v84_v7 = vmul.f32 0.2, %v68_v2  ;;  %v54_v8 = vmax.f32 %v38_v62, 0.0  ;;  %v70_v9 = vmin.f32 %v38_v62, 0.0 }
  0x23   :  { %114 = vst.msk [vmem:[#allocation5 + $0x50] sm:$0xff] %vm103_vm0, %v97_v0  ;;  %v99_v10 = vadd.f32 %v83_v4, %v51_v60  ;;  %v85_v11 = vmul.f32 0.2, %v69_v6  ;;  %p171_p12 = pnand %p170_p11, %p164_p8 }
  0x24   :  { %115 = vst.msk [vmem:[#allocation5 + $0x58] sm:$0xff] %vm103_vm0, %v98_v3  ;;  %v100_v12 = vadd.f32 %v84_v7, %v52_v1  ;;  %v86_v13 = vmul.f32 0.2, %v70_v9 }
  0x25   :  { %116 = vst.msk [vmem:[#allocation5 + $0x60] sm:$0xff] %vm103_vm0, %v99_v10  ;;  %v101_v14 = vadd.f32 %v85_v11, %v53_v5 }
  0x26   :  { %117 = vst.msk [vmem:[#allocation5 + $0x68] sm:$0xff] %vm103_vm0, %v100_v12  ;;  %v102_v15 = vadd.f32 %v86_v13, %v54_v8 }
  0x27   :  { %118 = vst.msk [vmem:[#allocation5 + $0x70] sm:$0xff] %vm103_vm0, %v101_v14 }
  0x28   :  { %119 = vst.msk [vmem:[#allocation5 + $0x78] sm:$0xff] %vm103_vm0, %v102_v15 }
  0x29   :  { %174 = shalt.err (!%p171_p12)
}
  0x2a   :  { %s175_s24 = scalar_lea.hbm %s250_s1, 2048 }
  0x2b   :  { %p176_p13 = scmp.ne.s32.totalorder %s250_s1, %s175_s24  ;;  %p179_p0 = scmp.lt.u32.totalorder %s175_s24, %s250_s1 }
  0x2d   :  { %p181_p1 = pnand %p179_p0, %p176_p13 }
  0x2f   :  { %184 = shalt.err (!%p181_p1)
}
  0x30   :  { %131 = dma.vmem_to_hbm [thread:$0]  %s126_s20, 2048, %s250_s1, [#allocation4], %s190_s16, %s190_s16, %s191_s17  }
  0x31   :  { %187 = dma.done.wait [#allocation4], 2048  }
  0x32   :  { %188 = vsyncadd [#allocation4], 4294965248 }
  0x33   :  { %135 = vsyncpa [#allocation3], 1 }
  0x34   :  { %136 = vsyncpa [#allocation4], 1 }

</bundles_post_ra>
